<compile_context>
chip_gen: v7x
topology: tpu7x:2x2x1
jax: 0.10.0
libtpu: 0.0.40
codegen_flags: <defaults>
</compile_context>

<pallas_src>
import math
from functools import partial

import jax
import jax.numpy as jnp
from jax import lax
from jax.experimental import pallas as pl
from jax.experimental.pallas import tpu as pltpu

_MASK_PAD = -1e30        # large-negative (not -inf) so padded rows/cols never NaN
_STATS_LANES = 128       # lane-dense running-stat scratch width


def _round_up(x, m):
    return (x + m - 1) // m * m


def _flash_kernel(q_ref, k_ref, v_ref, mask_ref, o_ref,
                  q_sc, m_sc, l_sc, acc_sc, *, scale):
    kv = pl.program_id(2)

    @pl.when(kv == 0)
    def _init():
        # q block is resident across the kv axis: scale + bf16-cast it once per
        # (batch, q-tile) instead of once per kv step.
        q_sc[...] = (q_ref[...].astype(jnp.float32) * scale).astype(jnp.bfloat16)
        m_sc[...] = jnp.full_like(m_sc, -jnp.inf)
        l_sc[...] = jnp.zeros_like(l_sc)
        acc_sc[...] = jnp.zeros_like(acc_sc)

    q = q_sc[...]                              # (TQ, D)  bf16, pre-scaled
    k = k_ref[...].astype(jnp.bfloat16)        # (TK, D)  bf16
    v = v_ref[...].astype(jnp.bfloat16)        # (TK, Dv) bf16
    m = mask_ref[...].astype(jnp.float32)      # (TQ, TK) f32 (mask may arrive bf16)

    # Transpose-free q @ k^T: bf16 operands on the MXU, f32 accumulation.
    s = lax.dot_general(
        q, k,
        dimension_numbers=(((1,), (1,)), ((), ())),
        preferred_element_type=jnp.float32,
    ) + m                                      # (TQ, TK) f32

    # Online (flash) softmax. Stats live lane-dense in (TQ, 128) scratch; all
    # lanes hold the same value, lane 0 is the canonical copy.
    m_prev = m_sc[...][:, :1]                  # (TQ, 1)
    l_prev = l_sc[...][:, :1]                  # (TQ, 1)
    m_new = jnp.maximum(m_prev, jnp.max(s, axis=-1, keepdims=True))
    alpha = jnp.exp(m_prev - m_new)
    p = jnp.exp(s - m_new)
    l_new = alpha * l_prev + jnp.sum(p, axis=-1, keepdims=True)
    acc_sc[...] = alpha * acc_sc[...] + jnp.dot(
        p.astype(jnp.bfloat16), v, preferred_element_type=jnp.float32)
    m_sc[...] = jnp.broadcast_to(m_new, m_sc.shape)   # full-width unmasked store
    l_sc[...] = jnp.broadcast_to(l_new, l_sc.shape)

    @pl.when(kv == pl.num_programs(2) - 1)
    def _finalize():
        inv_l = pl.reciprocal(l_sc[...][:, :1], approx=True)   # EUP slot, ~free
        o_ref[...] = (acc_sc[...] * inv_l).astype(o_ref.dtype)


def sdpa_with_mask(q, k, v, attn_mask, *, tq=256, tk=256):
    """Scaled dot-product attention with an additive mask (flash-style Pallas)."""
    B, S, D = q.shape
    Dv = v.shape[-1]
    assert k.shape == (B, S, D)
    assert v.shape == (B, S, Dv)
    assert attn_mask.shape == (B, S, S)
    out_dtype = q.dtype

    # Tile selection: single full-S block when S fits in one tile; otherwise pad
    # S up to a tile multiple (never fall back to a full (S, S) mask block).
    tq = S if S <= tq else tq
    tk = S if S <= tk else tk
    sq = _round_up(S, tq)
    sk = _round_up(S, tk)
    if sq != S or sk != S:
        q = jnp.pad(q, ((0, 0), (0, sq - S), (0, 0)))
        k = jnp.pad(k, ((0, 0), (0, sk - S), (0, 0)))
        v = jnp.pad(v, ((0, 0), (0, sk - S), (0, 0)))
        attn_mask = jnp.pad(attn_mask, ((0, 0), (0, sq - S), (0, sk - S)),
                            constant_values=_MASK_PAD)
    nq, nk = sq // tq, sk // tk
    scale = 1.0 / math.sqrt(D)

    kernel = partial(_flash_kernel, scale=scale)

    out = pl.pallas_call(
        kernel,
        out_shape=jax.ShapeDtypeStruct((B, sq, Dv), out_dtype),
        grid_spec=pltpu.PrefetchScalarGridSpec(
            num_scalar_prefetch=0,
            grid=(B, nq, nk),
            in_specs=[
                pl.BlockSpec((None, tq, D), lambda b, qi, ki: (b, qi, 0)),
                pl.BlockSpec((None, tk, D), lambda b, qi, ki: (b, ki, 0)),
                pl.BlockSpec((None, tk, Dv), lambda b, qi, ki: (b, ki, 0)),
                pl.BlockSpec((None, tq, tk), lambda b, qi, ki: (b, qi, ki)),
            ],
            out_specs=pl.BlockSpec((None, tq, Dv), lambda b, qi, ki: (b, qi, 0)),
            scratch_shapes=[
                pltpu.VMEM((tq, D), jnp.bfloat16),             # pre-scaled bf16 q
                pltpu.VMEM((tq, _STATS_LANES), jnp.float32),   # running max m
                pltpu.VMEM((tq, _STATS_LANES), jnp.float32),   # running denom l
                pltpu.VMEM((tq, Dv), jnp.float32),             # accumulator
            ],
        ),
        compiler_params=pltpu.CompilerParams(
            dimension_semantics=("parallel", "parallel", "arbitrary"),
            vmem_limit_bytes=32 * 1024 * 1024,  # footprint ~2 MiB; safe on v7x too
        ),
    )(q, k, v, attn_mask)
    return out[:, :S, :] if sq != S else out


def _reference(q, k, v, attn_mask):
    s = jnp.einsum("bqd,bkd->bqk", q, k,
                   precision=lax.Precision.HIGHEST) / math.sqrt(q.shape[-1])
    s = s + attn_mask
    w = jax.nn.softmax(s, axis=-1)
    return jnp.einsum("bqk,bkd->bqd", w, v, precision=lax.Precision.HIGHEST)


def _check(q, k, v, attn_mask):
    out = jax.block_until_ready(sdpa_with_mask(q, k, v, attn_mask))
    ref = _reference(q, k, v, attn_mask)
    assert out.shape == ref.shape
    # bf16 MXU operands => looser tolerance than a pure-f32 kernel.
    assert jnp.allclose(out, ref, atol=2e-2, rtol=2e-2), "mismatch vs reference"


if __name__ == "__main__":
    # --- Toy shapes matching the PyTorch snippet: q,k (1,4,8), v (1,4,4) ---
    B, S, D, Dv = 1, 4, 8, 4
    kq, kk, kv_, km = jax.random.split(jax.random.PRNGKey(0), 4)
    q = jax.random.normal(kq, (B, S, D), dtype=jnp.float32)
    k = jax.random.normal(kk, (B, S, D), dtype=jnp.float32)
    v = jax.random.normal(kv_, (B, S, Dv), dtype=jnp.float32)
    # attn_mask is an (undefined) module-global in the PyTorch code; create it
    # deterministically here as an additive (B, S, S) bias.
    attn_mask = jax.random.normal(km, (B, S, S), dtype=jnp.float32)
    _check(q, k, v, attn_mask)

    # --- Tiled flash path: S multiple of the 256 tile, nq even (megacore) ---
    B2, S2, D2, Dv2 = 2, 512, 32, 128
    k2q, k2k, k2v, k2m = jax.random.split(jax.random.PRNGKey(0), 4)
    q2 = jax.random.normal(k2q, (B2, S2, D2), dtype=jnp.float32)
    k2 = jax.random.normal(k2k, (B2, S2, D2), dtype=jnp.float32)
    v2 = jax.random.normal(k2v, (B2, S2, Dv2), dtype=jnp.float32)
    m2 = jax.random.normal(k2m, (B2, S2, S2), dtype=jnp.float32)
    _check(q2, k2, v2, m2)

    # --- Ragged S exercising the pad-to-tile path (320 -> padded to 512) ---
    B3, S3, D3, Dv3 = 1, 320, 32, 128
    k3q, k3k, k3v, k3m = jax.random.split(jax.random.PRNGKey(0), 4)
    q3 = jax.random.normal(k3q, (B3, S3, D3), dtype=jnp.float32)
    k3 = jax.random.normal(k3k, (B3, S3, D3), dtype=jnp.float32)
    v3 = jax.random.normal(k3v, (B3, S3, Dv3), dtype=jnp.float32)
    m3 = jax.random.normal(k3m, (B3, S3, S3), dtype=jnp.float32)
    _check(q3, k3, v3, m3)

    print("KERNEL_OK")
</pallas_src>

<mosaic_0001>
module attributes {stable_mosaic.version = 11 : i64} {
  func.func @_flash_kernel(%arg0: i32, %arg1: i32, %arg2: i32, %arg3: memref<1x4x8xf32, #tpu.memory_space<vmem>>, %arg4: memref<1x4x8xf32, #tpu.memory_space<vmem>>, %arg5: memref<1x4x4xf32, #tpu.memory_space<vmem>>, %arg6: memref<1x4x4xf32, #tpu.memory_space<vmem>>, %arg7: memref<1x4x4xf32, #tpu.memory_space<vmem>>, %arg8: memref<4x8xbf16, #tpu.memory_space<vmem>>, %arg9: memref<4x128xf32, #tpu.memory_space<vmem>>, %arg10: memref<4x128xf32, #tpu.memory_space<vmem>>, %arg11: memref<4x4xf32, #tpu.memory_space<vmem>>) attributes {dimension_semantics = [#tpu.dimension_semantics<parallel>, #tpu.dimension_semantics<parallel>, #tpu.dimension_semantics<arbitrary>], iteration_bounds = array<i64: 1, 1, 1>, scalar_prefetch = 0 : i64, scratch_operands = 4 : i64, tpu.core_type = #tpu.core_type<tc>, window_params = [{transform_indices = @transform_0, window_bounds = array<i64: 1, 4, 8>}, {transform_indices = @transform_1, window_bounds = array<i64: 1, 4, 8>}, {transform_indices = @transform_2, window_bounds = array<i64: 1, 4, 4>}, {transform_indices = @transform_3, window_bounds = array<i64: 1, 4, 4>}, {transform_indices = @transform_4, window_bounds = array<i64: 1, 4, 4>}]} {
    %c0_i32 = arith.constant 0 : i32
    %0 = arith.cmpi eq, %arg2, %c0_i32 : i32
    %1 = arith.extui %0 : i1 to i32
    %c0_i32_0 = arith.constant 0 : i32
    %2 = arith.cmpi ne, %1, %c0_i32_0 : i32
    scf.if %2 {
      %c0_28 = arith.constant 0 : index
      %c0_29 = arith.constant 0 : index
      %c0_30 = arith.constant 0 : index
      %46 = vector.load %arg3[%c0_28, %c0_29, %c0_30] : memref<1x4x8xf32, #tpu.memory_space<vmem>>, vector<1x4x8xf32>
      %47 = vector.shape_cast %46 : vector<1x4x8xf32> to vector<4x8xf32>
      %cst_31 = arith.constant 0.353553385 : f32
      %48 = vector.broadcast %cst_31 : f32 to vector<4x8xf32>
      %49 = arith.mulf %47, %48 : vector<4x8xf32>
      %50 = arith.truncf %49 : vector<4x8xf32> to vector<4x8xbf16>
      %c0_32 = arith.constant 0 : index
      %c0_33 = arith.constant 0 : index
      %51 = vector.load %arg8[%c0_32, %c0_33] : memref<4x8xbf16, #tpu.memory_space<vmem>>, vector<4x8xbf16>
      tpu.vector_store %arg8[%c0_32, %c0_33], %50 {strides = array<i32>} : memref<4x8xbf16, #tpu.memory_space<vmem>>, vector<4x8xbf16>,
      %cst_34 = arith.constant 0xFF800000 : f32
      %52 = vector.broadcast %cst_34 : f32 to vector<4x128xf32>
      %c0_35 = arith.constant 0 : index
      %c0_36 = arith.constant 0 : index
      %53 = vector.load %arg9[%c0_35, %c0_36] : memref<4x128xf32, #tpu.memory_space<vmem>>, vector<4x128xf32>
      tpu.vector_store %arg9[%c0_35, %c0_36], %52 {strides = array<i32>} : memref<4x128xf32, #tpu.memory_space<vmem>>, vector<4x128xf32>,
      %cst_37 = arith.constant 0.000000e+00 : f32
      %54 = vector.broadcast %cst_37 : f32 to vector<4x128xf32>
      %c0_38 = arith.constant 0 : index
      %c0_39 = arith.constant 0 : index
      %55 = vector.load %arg10[%c0_38, %c0_39] : memref<4x128xf32, #tpu.memory_space<vmem>>, vector<4x128xf32>
      tpu.vector_store %arg10[%c0_38, %c0_39], %54 {strides = array<i32>} : memref<4x128xf32, #tpu.memory_space<vmem>>, vector<4x128xf32>,
      %cst_40 = arith.constant 0.000000e+00 : f32
      %56 = vector.broadcast %cst_40 : f32 to vector<4x4xf32>
      %c0_41 = arith.constant 0 : index
      %c0_42 = arith.constant 0 : index
      %57 = vector.load %arg11[%c0_41, %c0_42] : memref<4x4xf32, #tpu.memory_space<vmem>>, vector<4x4xf32>
      tpu.vector_store %arg11[%c0_41, %c0_42], %56 {strides = array<i32>} : memref<4x4xf32, #tpu.memory_space<vmem>>, vector<4x4xf32>,
    } else {
    }
    %c0 = arith.constant 0 : index
    %c0_1 = arith.constant 0 : index
    %3 = vector.load %arg8[%c0, %c0_1] : memref<4x8xbf16, #tpu.memory_space<vmem>>, vector<4x8xbf16>
    %c0_2 = arith.constant 0 : index
    %c0_3 = arith.constant 0 : index
    %c0_4 = arith.constant 0 : index
    %4 = vector.load %arg4[%c0_2, %c0_3, %c0_4] : memref<1x4x8xf32, #tpu.memory_space<vmem>>, vector<1x4x8xf32>
    %5 = vector.shape_cast %4 : vector<1x4x8xf32> to vector<4x8xf32>
    %6 = arith.truncf %5 : vector<4x8xf32> to vector<4x8xbf16>
    %c0_5 = arith.constant 0 : index
    %c0_6 = arith.constant 0 : index
    %c0_7 = arith.constant 0 : index
    %7 = vector.load %arg5[%c0_5, %c0_6, %c0_7] : memref<1x4x4xf32, #tpu.memory_space<vmem>>, vector<1x4x4xf32>
    %8 = vector.shape_cast %7 : vector<1x4x4xf32> to vector<4x4xf32>
    %9 = arith.truncf %8 : vector<4x4xf32> to vector<4x4xbf16>
    %c0_8 = arith.constant 0 : index
    %c0_9 = arith.constant 0 : index
    %c0_10 = arith.constant 0 : index
    %10 = vector.load %arg6[%c0_8, %c0_9, %c0_10] : memref<1x4x4xf32, #tpu.memory_space<vmem>>, vector<1x4x4xf32>
    %11 = vector.shape_cast %10 : vector<1x4x4xf32> to vector<4x4xf32>
    %cst = arith.constant dense<0.000000e+00> : vector<4x4xf32>
    %12 = tpu.matmul %3, %6, %cst {dimension_numbers = #tpu.dot_dimension_numbers<[1], [1], [0], [0], [0, 0, 1, 0], [], []>} : vector<4x8xbf16>, vector<4x8xbf16>, vector<4x4xf32> -> vector<4x4xf32>
    %13 = arith.addf %12, %11 : vector<4x4xf32>
    %c0_11 = arith.constant 0 : index
    %c0_12 = arith.constant 0 : index
    %14 = vector.load %arg9[%c0_11, %c0_12] : memref<4x128xf32, #tpu.memory_space<vmem>>, vector<4x128xf32>
    %15 = vector.extract_strided_slice %14 {offsets = [0, 0], sizes = [4, 1], strides = [1, 1]} : vector<4x128xf32> to vector<4x1xf32>
    %c0_13 = arith.constant 0 : index
    %c0_14 = arith.constant 0 : index
    %16 = vector.load %arg10[%c0_13, %c0_14] : memref<4x128xf32, #tpu.memory_space<vmem>>, vector<4x128xf32>
    %17 = vector.extract_strided_slice %16 {offsets = [0, 0], sizes = [4, 1], strides = [1, 1]} : vector<4x128xf32> to vector<4x1xf32>
    %cst_15 = arith.constant dense<0xFF800000> : vector<4xf32>
    %18 = vector.multi_reduction <maximumf>, %13, %cst_15 [1] : vector<4x4xf32> to vector<4xf32>
    %19 = vector.shape_cast %18 : vector<4xf32> to vector<4x1xf32>
    %20 = arith.maximumf %15, %19 : vector<4x1xf32>
    %21 = arith.subf %15, %20 : vector<4x1xf32>
    %22 = math.exp %21 : vector<4x1xf32>
    %23 = vector.broadcast %20 : vector<4x1xf32> to vector<4x4xf32>
    %24 = arith.subf %13, %23 : vector<4x4xf32>
    %25 = math.exp %24 : vector<4x4xf32>
    %26 = arith.mulf %22, %17 : vector<4x1xf32>
    %cst_16 = arith.constant dense<0.000000e+00> : vector<4xf32>
    %27 = vector.multi_reduction <add>, %25, %cst_16 [1] : vector<4x4xf32> to vector<4xf32>
    %28 = vector.shape_cast %27 : vector<4xf32> to vector<4x1xf32>
    %29 = arith.addf %26, %28 : vector<4x1xf32>
    %c0_17 = arith.constant 0 : index
    %c0_18 = arith.constant 0 : index
    %30 = vector.load %arg11[%c0_17, %c0_18] : memref<4x4xf32, #tpu.memory_space<vmem>>, vector<4x4xf32>
    %31 = vector.broadcast %22 : vector<4x1xf32> to vector<4x4xf32>
    %32 = arith.mulf %31, %30 : vector<4x4xf32>
    %33 = arith.truncf %25 : vector<4x4xf32> to vector<4x4xbf16>
    %cst_19 = arith.constant dense<0.000000e+00> : vector<4x4xf32>
    %34 = tpu.matmul %33, %9, %cst_19 {dimension_numbers = #tpu.dot_dimension_numbers<[1], [0], [0], [1], [0, 0, 1, 1], [], []>} : vector<4x4xbf16>, vector<4x4xbf16>, vector<4x4xf32> -> vector<4x4xf32>
    %35 = arith.addf %32, %34 : vector<4x4xf32>
    %c0_20 = arith.constant 0 : index
    %c0_21 = arith.constant 0 : index
    %36 = vector.load %arg11[%c0_20, %c0_21] : memref<4x4xf32, #tpu.memory_space<vmem>>, vector<4x4xf32>
    tpu.vector_store %arg11[%c0_20, %c0_21], %35 {strides = array<i32>} : memref<4x4xf32, #tpu.memory_space<vmem>>, vector<4x4xf32>,
    %37 = vector.shape_cast %20 : vector<4x1xf32> to vector<4x1xf32>
    %38 = vector.broadcast %37 : vector<4x1xf32> to vector<4x128xf32>
    %c0_22 = arith.constant 0 : index
    %c0_23 = arith.constant 0 : index
    %39 = vector.load %arg9[%c0_22, %c0_23] : memref<4x128xf32, #tpu.memory_space<vmem>>, vector<4x128xf32>
    tpu.vector_store %arg9[%c0_22, %c0_23], %38 {strides = array<i32>} : memref<4x128xf32, #tpu.memory_space<vmem>>, vector<4x128xf32>,
    %40 = vector.shape_cast %29 : vector<4x1xf32> to vector<4x1xf32>
    %41 = vector.broadcast %40 : vector<4x1xf32> to vector<4x128xf32>
    %c0_24 = arith.constant 0 : index
    %c0_25 = arith.constant 0 : index
    %42 = vector.load %arg10[%c0_24, %c0_25] : memref<4x128xf32, #tpu.memory_space<vmem>>, vector<4x128xf32>
    tpu.vector_store %arg10[%c0_24, %c0_25], %41 {strides = array<i32>} : memref<4x128xf32, #tpu.memory_space<vmem>>, vector<4x128xf32>,
    %c0_i32_26 = arith.constant 0 : i32
    %43 = arith.cmpi eq, %arg2, %c0_i32_26 : i32
    %44 = arith.extui %43 : i1 to i32
    %c0_i32_27 = arith.constant 0 : i32
    %45 = arith.cmpi ne, %44, %c0_i32_27 : i32
    scf.if %45 {
      %c0_28 = arith.constant 0 : index
      %c0_29 = arith.constant 0 : index
      %46 = vector.load %arg10[%c0_28, %c0_29] : memref<4x128xf32, #tpu.memory_space<vmem>>, vector<4x128xf32>
      %47 = vector.extract_strided_slice %46 {offsets = [0, 0], sizes = [4, 1], strides = [1, 1]} : vector<4x128xf32> to vector<4x1xf32>
      %48 = tpu.reciprocal %47 {approx = true} : vector<4x1xf32> -> vector<4x1xf32>
      %c0_30 = arith.constant 0 : index
      %c0_31 = arith.constant 0 : index
      %49 = vector.load %arg11[%c0_30, %c0_31] : memref<4x4xf32, #tpu.memory_space<vmem>>, vector<4x4xf32>
      %50 = vector.broadcast %48 : vector<4x1xf32> to vector<4x4xf32>
      %51 = arith.mulf %49, %50 : vector<4x4xf32>
      %c0_32 = arith.constant 0 : index
      %c0_33 = arith.constant 0 : index
      %c0_34 = arith.constant 0 : index
      %52 = vector.load %arg7[%c0_32, %c0_33, %c0_34] : memref<1x4x4xf32, #tpu.memory_space<vmem>>, vector<1x4x4xf32>
      %53 = vector.shape_cast %52 : vector<1x4x4xf32> to vector<4x4xf32>
      %54 = vector.shape_cast %51 : vector<4x4xf32> to vector<1x4x4xf32>
      tpu.vector_store %arg7[%c0_32, %c0_33, %c0_34], %54 {strides = array<i32>} : memref<1x4x4xf32, #tpu.memory_space<vmem>>, vector<1x4x4xf32>,
    } else {
    }
    return
  }
  func.func @transform_0(%arg0: i32, %arg1: i32, %arg2: i32) -> (i32, i32, i32) {
    %c0_i32 = arith.constant 0 : i32
    %c0_i32_0 = arith.constant 0 : i32
    return %arg0, %arg1, %c0_i32 : i32, i32, i32
  }
  func.func @transform_1(%arg0: i32, %arg1: i32, %arg2: i32) -> (i32, i32, i32) {
    %c0_i32 = arith.constant 0 : i32
    %c0_i32_0 = arith.constant 0 : i32
    return %arg0, %arg2, %c0_i32 : i32, i32, i32
  }
  func.func @transform_2(%arg0: i32, %arg1: i32, %arg2: i32) -> (i32, i32, i32) {
    %c0_i32 = arith.constant 0 : i32
    %c0_i32_0 = arith.constant 0 : i32
    return %arg0, %arg2, %c0_i32 : i32, i32, i32
  }
  func.func @transform_3(%arg0: i32, %arg1: i32, %arg2: i32) -> (i32, i32, i32) {
    %c0_i32 = arith.constant 0 : i32
    return %arg0, %arg1, %arg2 : i32, i32, i32
  }
  func.func @transform_4(%arg0: i32, %arg1: i32, %arg2: i32) -> (i32, i32, i32) {
    %c0_i32 = arith.constant 0 : i32
    %c0_i32_0 = arith.constant 0 : i32
    return %arg0, %arg1, %c0_i32 : i32, i32, i32
  }
}

</mosaic_0001>

<bundles_post_ra>
// kernel: tpu_custom_call.1
= control target key start
LH: loop header
LB: loop body
LE: loop exit
PB: predicated region body
PF: predicated region fallthrough
CT: control target
= control target key end

     0   :  { %9 = vsyncpa [#allocation7], 0  ;;  %s410_s0 = inlined_call_operand.hbm [shape: f32[1,4,8], index: 0, kind: input, shape index: {}]   ;;  %s411_s1 = inlined_call_operand.hbm [shape: f32[1,4,8], index: 1, kind: input, shape index: {}]   ;;  %s412_s2 = inlined_call_operand.vmem [shape: f32[1,4,4], index: 2, kind: input, shape index: {}]   ;;  %s413_s3 = inlined_call_operand.vmem [shape: f32[1,4,4], index: 3, kind: input, shape index: {}]   ;;  %s414_s4 = inlined_call_operand.hbm [shape: f32[1,4,4], index: 4, kind: output, shape index: {}]  }
   0x1   :  { %10 = vsyncpa [#allocation10], 0 }
   0x2   :  { %11 = vsyncpa [#allocation8], 0  ;;  %s331_s15 = smov [#allocation6]   ;;  %s332_s17 = smov [#allocation9]  }
   0x3   :  { %s18_s16 = sshll.u32 %s331_s15, 4  ;;  %s28_s18 = sshll.u32 %s332_s17, 4  ;;  %s19_s16 = int_to_ptr.vmem [resolvable:$true] %s18_s16  ;;  %s29_s18 = int_to_ptr.vmem [resolvable:$true] %s28_s18 }
   0x4   :  { %s259_s21 = scalar_lea.hbm %s410_s0, 64 }
   0x5   :  { %p260_p0 = scmp.ne.s32.totalorder %s410_s0, %s259_s21  ;;  %p263_p1 = scmp.lt.u32.totalorder %s259_s21, %s410_s0 }
   0x7   :  { %p265_p2 = pnand %p263_p1, %p260_p0 }
   0x9   :  { %268 = shalt.err (!%p265_p2)
}
   0xa   :  { %s269_s26 = scalar_lea.vmem %s19_s16, 64  ;;  %p274_p4 = scmp.lt.s32.totalorder %s19_s16, %s19_s16 }
   0xb   :  { %p270_p3 = scmp.ne.s32.totalorder %s19_s16, %s269_s26  ;;  %p275_p5 = scmp.lt.s32.totalorder %s269_s26, %s269_s26 }
   0xd   :  { %p276_p6 = por %p275_p5, %p274_p4 }
   0xf   :  { %p277_p7 = pnand %p276_p6, %p270_p3 }
  0x11   :  { %280 = shalt.err (!%p277_p7)
}
  0x12   :  { %21 = dma.hbm_to_vmem [thread:$0]  %s410_s0, 64, %s19_s16, [#allocation7]  }
  0x13   :  { %s281_s5 = scalar_lea.hbm %s411_s1, 64 }
  0x14   :  { %p282_p8 = scmp.ne.s32.totalorder %s411_s1, %s281_s5  ;;  %p285_p9 = scmp.lt.u32.totalorder %s281_s5, %s411_s1 }
  0x16   :  { %p287_p10 = pnand %p285_p9, %p282_p8 }
  0x18   :  { %290 = shalt.err (!%p287_p10)
}
  0x19   :  { %s291_s10 = scalar_lea.vmem %s29_s18, 64  ;;  %p296_p12 = scmp.lt.s32.totalorder %s29_s18, %s29_s18 }
  0x1a   :  { %p292_p11 = scmp.ne.s32.totalorder %s29_s18, %s291_s10  ;;  %p297_p13 = scmp.lt.s32.totalorder %s291_s10, %s291_s10 }
  0x1c   :  { %p298_p0 = por %p297_p13, %p296_p12 }
  0x1e   :  { %p299_p1 = pnand %p298_p0, %p292_p11 }
  0x20   :  { %302 = shalt.err (!%p299_p1)
}
  0x21   :  { %31 = dma.hbm_to_vmem [thread:$0]  %s411_s1, 64, %s29_s18, [#allocation10]  }
  0x22   :  { %325 = dma.done.wait [#allocation7], 64  }
  0x23   :  { %326 = vsyncadd [#allocation7], 4294967232 }
  0x24   :  { %327 = dma.done.wait [#allocation10], 64  }
  0x25   :  { %328 = vsyncadd [#allocation10], 4294967232  ;;  %v333_v0 = vmov 0.0   ;;  %vm334_vm0 = vmmov 0   ;;  %v57_v1 = vld [vmem:[#allocation9] sm:$0xf] }
  0x26   :  { %53 = vst [vmem:[#allocation4] sm:$0xf] %v333_v0  ;;  %232 = vmatprep.subr.bf16.mxu0 %v333_v0  ;;  %234 = vmatprep.mubr.msk.bf16.mxu0 %vm334_vm0, %v333_v0  ;;  %vm62_vm1 = vcmask 64512   ;;  %v47_v2 = vld [vmem:[#allocation6] sm:$0xf]  ;;  %v58_v3 = vpack.c.bf16 %v57_v1, %v57_v1  ;;  %vm50_vm2 = vcmask 58368  }
  0x27   :  { %238 = vmatprep.subr.bf16.mxu1 %v333_v0  ;;  %240 = vmatprep.mubr.msk.bf16.mxu1 %vm334_vm0, %v333_v0  ;;  %v48_v4 = vmul.f32 0.35355338, %v47_v2  ;;  %vm54_vm3 = vcmask 27648   ;;  %v335_v8 = vmov -inf   ;;  %v61_v9 = vld [vmem:[%s413_s3] sm:$0xf] }
  0x28   :  { %v67_v5 = vsel %vm62_vm1, %v58_v3, 0  ;;  %55 = vst.msk [vmem:[#allocation5] sm:$0xf] %vm54_vm3, %v333_v0  ;;  %52 = vst [vmem:[#allocation3] sm:$0xf] %v335_v8  ;;  %v336_v16 = vmov 0  }
  0x29   :  { %v49_v6 = vpack.c.bf16 %v48_v4, %v48_v4  ;;  %233 = vmatpush3.bf16.xpose.msra.mxu0 %v67_v5  ;;  %251 = vset.pattern.permute.xlu0 %v336_v16  ;;  %v59_v20 = vld [vmem:[%s412_s2] sm:$0xf]  ;;  %vm144_vm4 = vcmask 1041408   ;;  %vm140_vm5 = vcmask 31744   ;;  %s337_s2 = smov [#allocation11]  }
  0x2a   :  { %252 = vset.pattern.permute.xlu1 %v336_v16  ;;  %v60_v21 = vpack.c.bf16 %v59_v20, %v59_v20  ;;  %s216_s3 = sshll.u32 %s337_s2, 4  ;;  %s217_s3 = int_to_ptr.vmem [resolvable:$true] %s216_s3 }
  0x2b   :  { %51 = vst.msk [vmem:[#allocation2] sm:$0x3] %vm50_vm2, %v49_v6  ;;  %s303_s15 = scalar_lea.vmem %s217_s3, 64  ;;  %p308_p3 = scmp.lt.s32.totalorder %s217_s3, %s217_s3 }
  0x2c   :  { %v146_v22 = vsel %vm144_vm4, %v60_v21, 0  ;;  %p304_p2 = scmp.ne.s32.totalorder %s217_s3, %s303_s15  ;;  %p309_p4 = scmp.lt.s32.totalorder %s303_s15, %s303_s15 }
  0x2d   :  { %239 = vmatpush3.bf16.msra.mxu1 %v146_v22  ;;  %v110_v32 = vld [vmem:[#allocation4] sm:$0xf] }
  0x2e   :  { %p310_p5 = por %p309_p4, %p308_p3 }
  0x2f   :  { %v109_v17 = vld [vmem:[#allocation3] sm:$0xf]  ;;  %v132_v41 = vld [vmem:[#allocation5] sm:$0xf] }
  0x30   :  { %p311_p6 = pnand %p310_p5, %p304_p2 }
  0x32   :  { %v56_v7 = vld [vmem:[#allocation2] sm:$0x3] }
  0x33   :  { %235 = vmatmul.mubr.msk.bf16.vlgmr.msra.gmra.mrb[0].mxu0 %vm62_vm1, %v56_v7 }
 0x106   :  { %v103_v10 = vpop.f32.mrb[0].mxu0 }
 0x107   :  { %v104_v11 = vadd.f32 %v103_v10, %v61_v9  ;;  %v236_v12 = vpop.f32.mrb[1].mxu0 }
 0x108   :  { %v106_v13 = vpop.f32.mrb[2].mxu0 }
 0x109   :  { %v237_v14 = vpop.f32.mrb[3].mxu0  ;;  %v112_v15 = vsel %vm54_vm3, %v104_v11, -inf }
 0x10a   :  { %113 = vmax.xlane.f32.xlu0 %v112_v15 }
 0x197   :  { %v114_v18 = vpop.xlane.xlu0 %113 }
 0x198   :  { %v115_v19 = vmax.f32 %v109_v17, %v114_v18 }
 0x19a   :  { %121 = vperm.xlu0 %251, %v115_v19   ;;  %v116_v29 = vsub.f32 %v109_v17, %v115_v19 }
 0x19c   :  { %v117_v30 = vmul.f32 1.442695, %v116_v29 }
 0x219   :  { %v122_v23 = vpop.permute.xlu0 %121 }
 0x21a   :  { %v124_v24 = vsub.f32 %v104_v11, %v122_v23  ;;  %190 = vst [vmem:[#allocation3] sm:$0xf] %v122_v23 }
 0x21c   :  { %v125_v25 = vmul.f32 1.442695, %v124_v24 }
 0x21e   :  { %253 = vpow2.f32 %v125_v25 }
 0x21f   :  { %255 = vpow2.f32 %v117_v30 }
 0x228   :  { %v254_v26 = vpop.eup %253 }
 0x229   :  { %v128_v27 = vsel %vm54_vm3, %v254_v26, 0.0  ;;  %v139_v28 = vpack.c.bf16 %v254_v26, %v254_v26  ;;  %v256_v31 = vpop.eup %255 }
 0x22a   :  { %129 = vadd.xlane.f32.xlu1 %v128_v27  ;;  %v127_v33 = vmul.f32 %v256_v31, %v110_v32 }
 0x22b   :  { %241 = vmatmul.mubr.msk.bf16.vlgmr.msra.gmra.mrb[0].mxu1 %vm140_vm5, %v139_v28 }
 0x2b7   :  { %v130_v34 = vpop.xlane.xlu1 %129 }
 0x2b8   :  { %v131_v35 = vadd.f32 %v130_v34, %v127_v33 }
 0x2ba   :  { %193 = vperm.xlu1 %252, %v131_v35  }
 0x2be   :  { %135 = vperm.xlu1 %252, %v256_v31  }
 0x2fe   :  { %v182_v36 = vpop.f32.mrb[0].mxu1 }
 0x2ff   :  { %v242_v37 = vpop.f32.mrb[1].mxu1 }
 0x300   :  { %v185_v38 = vpop.f32.mrb[2].mxu1 }
 0x301   :  { %v243_v39 = vpop.f32.mrb[3].mxu1 }
 0x339   :  { %v194_v40 = vpop.permute.xlu1 %193 }
 0x33a   :  { %196 = vst [vmem:[#allocation4] sm:$0xf] %v194_v40 }
 0x33d   :  { %v136_v42 = vpop.permute.xlu1 %135 }
 0x33e   :  { %v138_v43 = vmul.f32 %v136_v42, %v132_v41 }
 0x340   :  { %v188_v44 = vadd.f32 %v182_v36, %v138_v43 }
 0x341   :  { %v200_v45 = vld [vmem:[#allocation4] sm:$0xf] }
 0x342   :  { %189 = vst.msk [vmem:[#allocation5] sm:$0xf] %vm54_vm3, %v188_v44  ;;  %257 = vrcp.f32 %v200_v45 }
 0x349   :  { %v202_v47 = vld [vmem:[#allocation5] sm:$0xf] }
 0x34c   :  { %v258_v46 = vpop.eup %257 }
 0x34d   :  { %205 = vperm.xlu1 %252, %v258_v46  }
 0x3cc   :  { %v206_v48 = vpop.permute.xlu1 %205 }
 0x3cd   :  { %v208_v49 = vmul.f32 %v206_v48, %v202_v47 }
 0x3cf   :  { %209 = vst.msk [vmem:[#allocation11] sm:$0xf] %vm54_vm3, %v208_v49 }
 0x3d0   :  { %314 = shalt.err (!%p311_p6)
}
 0x3d1   :  { %s315_s18 = scalar_lea.hbm %s414_s4, 64 }
 0x3d2   :  { %p316_p7 = scmp.ne.s32.totalorder %s414_s4, %s315_s18  ;;  %p319_p8 = scmp.lt.u32.totalorder %s315_s18, %s414_s4 }
 0x3d4   :  { %p321_p9 = pnand %p319_p8, %p316_p7 }
 0x3d6   :  { %324 = shalt.err (!%p321_p9)
}
 0x3d7   :  { %219 = dma.vmem_to_hbm [thread:$0]  %s217_s3, 64, %s414_s4, [#allocation8]  }
 0x3d8   :  { %329 = dma.done.wait [#allocation8], 64  }
 0x3d9   :  { %330 = vsyncadd [#allocation8], 4294967232 }
 0x3da   :  { %223 = vsyncpa [#allocation7], 1 }
 0x3db   :  { %224 = vsyncpa [#allocation10], 1 }
 0x3dc   :  { %225 = vsyncpa [#allocation8], 1 }

</bundles_post_ra>
